<compile_context>
chip_gen: v5e
topology: v5e:2x2
jax: 0.10.0
libtpu: 0.0.40
codegen_flags: <defaults>
</compile_context>

<pallas_src>
import functools

import jax
import jax.numpy as jnp
from jax.experimental import pallas as pl
from jax.experimental.pallas import tpu as pltpu


def _ce_kernel(p_valid, logits_ref, tgt_ref, w_ref, loss_ref, wsum_ref):
    """One (image, pixel-tile) step of weighted cross entropy.

    logits_ref: (C, T)  native dtype  -- class-major logits, pixels on lanes
    tgt_ref:    (1, T)  any int       -- target class per pixel
    w_ref:      (C, 1)  f32           -- per-class weights
    loss_ref:   (1, 1)  f32 out       -- this tile's sum of weight[t] * nll
    wsum_ref:   (1, 1)  f32 out       -- this tile's sum of weight[t]
    """
    j = pl.program_id(1)

    x = logits_ref[...].astype(jnp.float32)          # (C, T)
    t = tgt_ref[...].astype(jnp.int32)               # (1, T)
    w = w_ref[...].astype(jnp.float32)               # (C, 1)
    c, tpix = x.shape

    # Numerically-stable log-sum-exp over the (small) class/sublane axis.
    m = jnp.max(x, axis=0, keepdims=True)                                # (1,T)
    lse = jnp.log(jnp.sum(jnp.exp(x - m), axis=0, keepdims=True)) + m    # (1,T)

    # Gather target-class logit and weight via a one-hot compare over C
    # (onehot computed once, reused by both selects).
    cls = jax.lax.broadcasted_iota(jnp.int32, (c, tpix), 0)              # (C,T)
    onehot = cls == t
    tgt_logit = jnp.sum(jnp.where(onehot, x, 0.0), axis=0, keepdims=True)
    wt = jnp.sum(jnp.where(onehot, w, 0.0), axis=0, keepdims=True)       # (1,T)

    # Mask pixels past the real spatial extent (ragged last tile); select, so
    # garbage (inf/NaN) in the padded part of the block cannot leak in.
    pix = jax.lax.broadcasted_iota(jnp.int32, (1, tpix), 1) + j * tpix
    valid = pix < p_valid
    nll = lse - tgt_logit                                                # (1,T)

    # Per-tile partial sums (cross-lane reduce on the XLU every step; the XLU
    # slot is otherwise idle).  Writing per-tile partials lets both grid axes
    # be "parallel" (megacore / v7x 2-TC friendly) with no accumulator state.
    loss_ref[...] = jnp.sum(jnp.where(valid, wt * nll, 0.0)).reshape(1, 1)
    wsum_ref[...] = jnp.sum(jnp.where(valid, wt, 0.0)).reshape(1, 1)


def cross_entropy_loss_2d(outputs, targets, weight=None,
                          tile_pix_max=256 * 1024,
                          vmem_budget_bytes=16 * 1024 * 1024):
    """Replicates CrossEntropyLoss2d.forward(outputs, targets).

    outputs: (N, C, H, W) float logits (NCHW, PyTorch convention; any float dtype)
    targets: (N, H, W)    integer class indices in [0, C) (any int dtype;
                          pass int8/int16 for lower HBM traffic)
    weight:  optional (C,) float per-class weights
    Returns a scalar f32 loss with PyTorch's weighted-mean reduction:
        sum_i weight[t_i] * nll_i / sum_i weight[t_i]
    """
    n, c, h, w_sp = outputs.shape
    p = h * w_sp
    if weight is None:
        weight = jnp.ones((c,), jnp.float32)

    # Free reshapes only: no transpose, no pad, no dtype cast in HBM.
    logits = outputs.reshape(n, c, p)
    tgt = targets.reshape(n, 1, p)                 # keep native int dtype
    w2d = jnp.asarray(weight, jnp.float32).reshape(c, 1)

    itemsize = jnp.dtype(outputs.dtype).itemsize
    tgt_itemsize = jnp.dtype(targets.dtype).itemsize

    # Honest per-pixel VMEM cost of one pixel of tile:
    #   double-buffered logits + targets blocks, ~4 live (C,T) f32
    #   intermediates inside the kernel, and a few (1,T) f32 vectors.
    bytes_per_pix = 2 * (c * itemsize + tgt_itemsize) + 4 * c * 4 + 8 * 4
    cap = max(128, (vmem_budget_bytes // bytes_per_pix) // 128 * 128)
    cap = min(cap, max(128, (tile_pix_max // 128) * 128))

    # Lane-dense pixel tile: always a 128-multiple <= P (or the full extent
    # when P < 128 / P % 128 == 0).  Never fall back to a whole-image block.
    if p % 128 == 0:
        tile_pix = min(cap, p)
    elif p < 128:
        tile_pix = p                       # full extent: always legal
    else:
        tile_pix = min(cap, (p // 128) * 128)   # ragged last tile, masked
    n_pix_tiles = pl.cdiv(p, tile_pix)

    cost = pl.CostEstimate(
        flops=int(6 * n * p * c),
        transcendentals=int(n * p * (c + 1)),
        bytes_accessed=int(logits.size * itemsize + tgt.size * tgt_itemsize
                           + w2d.size * 4),
    )

    kernel = functools.partial(_ce_kernel, p)
    loss_parts, wsum_parts = pl.pallas_call(
        kernel,
        out_shape=(jax.ShapeDtypeStruct((n, n_pix_tiles, 1, 1), jnp.float32),
                   jax.ShapeDtypeStruct((n, n_pix_tiles, 1, 1), jnp.float32)),
        grid=(n, n_pix_tiles),
        in_specs=[
            pl.BlockSpec((None, c, tile_pix), lambda b, j: (b, 0, j)),  # logits
            pl.BlockSpec((None, 1, tile_pix), lambda b, j: (b, 0, j)),  # targets
            pl.BlockSpec((c, 1), lambda b, j: (0, 0)),                  # weights
        ],
        out_specs=(
            pl.BlockSpec((None, None, 1, 1), lambda b, j: (b, j, 0, 0)),
            pl.BlockSpec((None, None, 1, 1), lambda b, j: (b, j, 0, 0)),
        ),
        compiler_params=pltpu.CompilerParams(
            dimension_semantics=("parallel", "parallel"),
            vmem_limit_bytes=32 * 1024 * 1024),
        cost_estimate=cost,
    )(logits, tgt, w2d)

    # Tiny (N, n_tiles) reduction + weighted-mean divide in the wrapper.
    return jnp.sum(loss_parts) / jnp.sum(wsum_parts)


def _reference(outputs, targets, weight):
    """Pure-JAX reference mirroring torch.nn.CrossEntropyLoss(weight)."""
    n, c, h, w_sp = outputs.shape
    x = jnp.transpose(outputs, (0, 2, 3, 1)).reshape(-1, c).astype(jnp.float32)
    t = targets.reshape(-1).astype(jnp.int32)
    logp = jax.nn.log_softmax(x, axis=-1)
    nll = -jnp.take_along_axis(logp, t[:, None], axis=-1)[:, 0]
    wt = weight[t]
    return jnp.sum(wt * nll) / jnp.sum(wt)


if __name__ == "__main__":
    key = jax.random.PRNGKey(0)
    k_logits, k_tgt = jax.random.split(key)

    N, C, H, W = 2, 4, 16, 16
    outputs = jax.random.normal(k_logits, (N, C, H, W), dtype=jnp.float32)
    targets = jax.random.randint(k_tgt, (N, H, W), 0, C, dtype=jnp.int32)

    # Deterministic per-class weights (the nn.CrossEntropyLoss(weight) param).
    class_weight = 1.0 + 0.1 * jnp.arange(C, dtype=jnp.float32)

    loss = cross_entropy_loss_2d(outputs, targets, class_weight)
    loss = jax.block_until_ready(loss)

    ref = _reference(outputs, targets, class_weight)
    assert jnp.allclose(loss, ref, rtol=1e-5, atol=1e-5), (loss, ref)

    print("KERNEL_OK")
</pallas_src>

<mosaic_0001>
module attributes {stable_mosaic.version = 11 : i64} {
  func.func @_ce_kernel(%arg0: i32, %arg1: i32, %arg2: memref<1x4x256xf32, #tpu.memory_space<vmem>>, %arg3: memref<1x1x256xi32, #tpu.memory_space<vmem>>, %arg4: memref<4x1xf32, #tpu.memory_space<vmem>>, %arg5: memref<1x1x1x1xf32, #tpu.memory_space<vmem>>, %arg6: memref<1x1x1x1xf32, #tpu.memory_space<vmem>>) attributes {dimension_semantics = [#tpu.dimension_semantics<parallel>, #tpu.dimension_semantics<parallel>], iteration_bounds = array<i64: 2, 1>, scalar_prefetch = 0 : i64, scratch_operands = 0 : i64, tpu.core_type = #tpu.core_type<tc>, window_params = [{transform_indices = @transform_0, window_bounds = array<i64: 1, 4, 256>}, {transform_indices = @transform_1, window_bounds = array<i64: 1, 1, 256>}, {pipeline_mode = #tpu.pipeline_mode<synchronous>, transform_indices = @transform_2, window_bounds = array<i64: 4, 1>}, {transform_indices = @transform_3, window_bounds = array<i64: 1, 1, 1, 1>}, {transform_indices = @transform_4, window_bounds = array<i64: 1, 1, 1, 1>}]} {
    %c0 = arith.constant 0 : index
    %c0_0 = arith.constant 0 : index
    %c0_1 = arith.constant 0 : index
    %0 = vector.load %arg2[%c0, %c0_0, %c0_1] : memref<1x4x256xf32, #tpu.memory_space<vmem>>, vector<1x4x256xf32>
    %1 = vector.shape_cast %0 : vector<1x4x256xf32> to vector<4x256xf32>
    %c0_2 = arith.constant 0 : index
    %c0_3 = arith.constant 0 : index
    %c0_4 = arith.constant 0 : index
    %2 = vector.load %arg3[%c0_2, %c0_3, %c0_4] : memref<1x1x256xi32, #tpu.memory_space<vmem>>, vector<1x1x256xi32>
    %3 = vector.shape_cast %2 : vector<1x1x256xi32> to vector<1x256xi32>
    %c0_5 = arith.constant 0 : index
    %c0_6 = arith.constant 0 : index
    %4 = vector.load %arg4[%c0_5, %c0_6] : memref<4x1xf32, #tpu.memory_space<vmem>>, vector<4x1xf32>
    %cst = arith.constant dense<0xFF800000> : vector<256xf32>
    %5 = vector.multi_reduction <maximumf>, %1, %cst [0] : vector<4x256xf32> to vector<256xf32>
    %6 = vector.shape_cast %5 : vector<256xf32> to vector<1x256xf32>
    %7 = vector.broadcast %6 : vector<1x256xf32> to vector<4x256xf32>
    %8 = arith.subf %1, %7 : vector<4x256xf32>
    %9 = math.exp %8 : vector<4x256xf32>
    %cst_7 = arith.constant dense<0.000000e+00> : vector<256xf32>
    %10 = vector.multi_reduction <add>, %9, %cst_7 [0] : vector<4x256xf32> to vector<256xf32>
    %11 = vector.shape_cast %10 : vector<256xf32> to vector<1x256xf32>
    %12 = math.log %11 : vector<1x256xf32>
    %13 = arith.addf %12, %6 : vector<1x256xf32>
    %14 = tpu.iota {dimensions = array<i32: 0>} : vector<4x256xi32>
    %15 = vector.broadcast %3 : vector<1x256xi32> to vector<4x256xi32>
    %16 = arith.cmpi eq, %14, %15 : vector<4x256xi32>
    %cst_8 = arith.constant 0.000000e+00 : f32
    %17 = vector.broadcast %cst_8 : f32 to vector<4x256xf32>
    %18 = arith.select %16, %1, %17 : vector<4x256xi1>, vector<4x256xf32>
    %cst_9 = arith.constant dense<0.000000e+00> : vector<256xf32>
    %19 = vector.multi_reduction <add>, %18, %cst_9 [0] : vector<4x256xf32> to vector<256xf32>
    %20 = vector.shape_cast %19 : vector<256xf32> to vector<1x256xf32>
    %cst_10 = arith.constant 0.000000e+00 : f32
    %21 = vector.shape_cast %4 : vector<4x1xf32> to vector<4x1xf32>
    %22 = vector.broadcast %21 : vector<4x1xf32> to vector<4x256xf32>
    %23 = vector.broadcast %cst_10 : f32 to vector<4x256xf32>
    %24 = arith.select %16, %22, %23 : vector<4x256xi1>, vector<4x256xf32>
    %cst_11 = arith.constant dense<0.000000e+00> : vector<256xf32>
    %25 = vector.multi_reduction <add>, %24, %cst_11 [0] : vector<4x256xf32> to vector<256xf32>
    %26 = vector.shape_cast %25 : vector<256xf32> to vector<1x256xf32>
    %27 = tpu.iota {dimensions = array<i32: 1>} : vector<1x256xi32>
    %c256_i32 = arith.constant 256 : i32
    %28 = arith.muli %arg1, %c256_i32 : i32
    %29 = vector.broadcast %28 : i32 to vector<1x256xi32>
    %30 = arith.addi %27, %29 : vector<1x256xi32>
    %c256_i32_12 = arith.constant 256 : i32
    %31 = vector.broadcast %c256_i32_12 : i32 to vector<1x256xi32>
    %32 = arith.cmpi slt, %30, %31 : vector<1x256xi32>
    %33 = arith.subf %13, %20 : vector<1x256xf32>
    %34 = arith.mulf %26, %33 : vector<1x256xf32>
    %cst_13 = arith.constant 0.000000e+00 : f32
    %35 = vector.broadcast %cst_13 : f32 to vector<1x256xf32>
    %36 = arith.select %32, %34, %35 : vector<1x256xi1>, vector<1x256xf32>
    %37 = vector.shape_cast %36 : vector<1x256xf32> to vector<1x1x256xf32>
    %cst_14 = arith.constant dense<0.000000e+00> : vector<1xf32>
    %38 = vector.multi_reduction <add>, %37, %cst_14 [1, 2] : vector<1x1x256xf32> to vector<1xf32>
    %39 = vector.shape_cast %38 : vector<1xf32> to vector<1x1x1xf32>
    %40 = vector.extract %39[0, 0, 0] : f32 from vector<1x1x1xf32>
    %41 = vector.broadcast %40 : f32 to vector<1x1xf32>
    %c0_15 = arith.constant 0 : index
    %c0_16 = arith.constant 0 : index
    %c0_17 = arith.constant 0 : index
    %c0_18 = arith.constant 0 : index
    %42 = vector.load %arg5[%c0_15, %c0_16, %c0_17, %c0_18] : memref<1x1x1x1xf32, #tpu.memory_space<vmem>>, vector<1x1x1x1xf32>
    %43 = vector.shape_cast %42 : vector<1x1x1x1xf32> to vector<1x1xf32>
    %44 = vector.shape_cast %41 : vector<1x1xf32> to vector<1x1x1x1xf32>
    tpu.vector_store %arg5[%c0_15, %c0_16, %c0_17, %c0_18], %44 {strides = array<i32>} : memref<1x1x1x1xf32, #tpu.memory_space<vmem>>, vector<1x1x1x1xf32>,
    %cst_19 = arith.constant 0.000000e+00 : f32
    %45 = vector.broadcast %cst_19 : f32 to vector<1x256xf32>
    %46 = arith.select %32, %26, %45 : vector<1x256xi1>, vector<1x256xf32>
    %47 = vector.shape_cast %46 : vector<1x256xf32> to vector<1x1x256xf32>
    %cst_20 = arith.constant dense<0.000000e+00> : vector<1xf32>
    %48 = vector.multi_reduction <add>, %47, %cst_20 [1, 2] : vector<1x1x256xf32> to vector<1xf32>
    %49 = vector.shape_cast %48 : vector<1xf32> to vector<1x1x1xf32>
    %50 = vector.extract %49[0, 0, 0] : f32 from vector<1x1x1xf32>
    %51 = vector.broadcast %50 : f32 to vector<1x1xf32>
    %c0_21 = arith.constant 0 : index
    %c0_22 = arith.constant 0 : index
    %c0_23 = arith.constant 0 : index
    %c0_24 = arith.constant 0 : index
    %52 = vector.load %arg6[%c0_21, %c0_22, %c0_23, %c0_24] : memref<1x1x1x1xf32, #tpu.memory_space<vmem>>, vector<1x1x1x1xf32>
    %53 = vector.shape_cast %52 : vector<1x1x1x1xf32> to vector<1x1xf32>
    %54 = vector.shape_cast %51 : vector<1x1xf32> to vector<1x1x1x1xf32>
    tpu.vector_store %arg6[%c0_21, %c0_22, %c0_23, %c0_24], %54 {strides = array<i32>} : memref<1x1x1x1xf32, #tpu.memory_space<vmem>>, vector<1x1x1x1xf32>,
    return
  }
  func.func @transform_0(%arg0: i32, %arg1: i32) -> (i32, i32, i32) {
    %c0_i32 = arith.constant 0 : i32
    %c0_i32_0 = arith.constant 0 : i32
    return %arg0, %c0_i32, %arg1 : i32, i32, i32
  }
  func.func @transform_1(%arg0: i32, %arg1: i32) -> (i32, i32, i32) {
    %c0_i32 = arith.constant 0 : i32
    %c0_i32_0 = arith.constant 0 : i32
    return %arg0, %c0_i32, %arg1 : i32, i32, i32
  }
  func.func @transform_2(%arg0: i32, %arg1: i32) -> (i32, i32) {
    %c0_i32 = arith.constant 0 : i32
    %c0_i32_0 = arith.constant 0 : i32
    %c0_i32_1 = arith.constant 0 : i32
    return %c0_i32, %c0_i32_0 : i32, i32
  }
  func.func @transform_3(%arg0: i32, %arg1: i32) -> (i32, i32, i32, i32) {
    %c0_i32 = arith.constant 0 : i32
    %c0_i32_0 = arith.constant 0 : i32
    %c0_i32_1 = arith.constant 0 : i32
    return %arg0, %arg1, %c0_i32, %c0_i32_0 : i32, i32, i32, i32
  }
  func.func @transform_4(%arg0: i32, %arg1: i32) -> (i32, i32, i32, i32) {
    %c0_i32 = arith.constant 0 : i32
    %c0_i32_0 = arith.constant 0 : i32
    %c0_i32_1 = arith.constant 0 : i32
    return %arg0, %arg1, %c0_i32, %c0_i32_0 : i32, i32, i32, i32
  }
}

</mosaic_0001>

<bundles_post_ra>
// kernel: tpu_custom_call.1
= control target key start
LH: loop header
LB: loop body
LE: loop exit
PB: predicated region body
PF: predicated region fallthrough
CT: control target
= control target key end

     0   :  { %10 = vsyncpa [#allocation3], 0  ;;  %s895_s0 = inlined_call_operand.hbm [shape: f32[2,4,256], index: 0, kind: input, shape index: {}]   ;;  %s896_s1 = inlined_call_operand.vmem [shape: s32[2,1,256], index: 1, kind: input, shape index: {}]   ;;  %s897_s2 = inlined_call_operand.vmem [shape: f32[4,1], index: 2, kind: input, shape index: {}]   ;;  %s898_s3 = inlined_call_operand.vmem [shape: f32[2,1,1,1], index: 3, kind: output, shape index: {0}]   ;;  %s899_s4 = inlined_call_operand.vmem [shape: f32[2,1,1,1], index: 4, kind: output, shape index: {1}]  }
   0x1   :  { %12 = vsyncpa [#allocation3 + $0x1], 0  ;;  %s760_s15 = smov 0   ;;  %s762_s16 = smov 0  }
   0x2   :  { %s764_s17 = smov 0   ;;  %s766_s18 = smov 0  }
   0x3   :  { %s768_s19 = smov 0   ;;  %s770_s20 = smov 0  }
   0x4 LB: > { %s572_s21 = sadd.s32 4294967295, %s732_s20   ;;  %s30_s22 = sadd.s32 1, %s728_s19  ;;  %s732_s20 = sphi %s770_s20, %s18_s20   ;;  %s728_s19 = sphi %s768_s19, %s910_s19   ;;  %s724_s18 = sphi %s766_s18, %s909_s18   ;;  %s720_s17 = sphi %s764_s17, %s908_s17   ;;  %s716_s16 = sphi %s762_s16, %s907_s16   ;;  %s712_s15 = sphi %s760_s15, %s906_s15  }
   0x5   : > { %p32_p0 = scmp.ge.s32.totalorder %s30_s22, 2  ;;  %s39_s23 = sadd.s32 1, %s720_s17 }
   0x6   : > { %p46_p1 = scmp.ne.s32.totalorder %s720_s17, %s716_s16  ;;  %p47_p2 = scmp.eq.s32.totalorder %s732_s20, 0 }
   0x7   : > { %s912_s22 = smov (%p32_p0, %s30_s22), 0  ;;  %p52_p4 = scmp.ne.s32.totalorder %s716_s16, %s712_s15 }
   0x8   : > { %p796_p3 = por %p47_p2, %p46_p1  ;;  %s34_s25 = ssub.s32 %s728_s19, %s912_s22 }
   0x9   : > { %p53_p5 = scmp.eq.s32.totalorder %s572_s21, 0  ;;  %p37_p6 = scmp.eq.s32.totalorder %s34_s25, 0 }
   0xa   : > { %p595_p8 = scmp.lt.s32.totalorder %s732_s20, 2  ;;  %s184_s28 = sand.u32 1, %s720_s17  }
   0xb   : > { %p803_p7 = por %p53_p5, %p52_p4  ;;  %s584_s29 = sshll.u32 %s728_s19, 3 }
   0xc   : > { %s809_s27 = scalar_select %p37_p6, %s720_s17, %s39_s23  }
   0xd   : > { %s576_s30 = sshll.u32 %s184_s28, 3  ;;  %s195_s7 = scalar_lea.hbm %s895_s0, %s584_s29 }
   0xe   : > { %s197_s8 = sshll.u32 %s195_s7, 4  ;;  %s188_s9 = scalar_lea.vmem [#allocation2], %s576_s30  ;;  %s198_s8 = int_to_ptr.hbm [resolvable:$true] %s197_s8 }
   0xf   : > { %s199_s10 = sshll.u32 %s188_s9, 4  ;;  %p592_p9 = pnand %p595_p8, %p796_p3  ;;  %s200_s10 = int_to_ptr.vmem [resolvable:$true] %s199_s10 }
  0x10   : > { %p579_p10 = scmp.ge.s32.totalorder %s732_s20, 1  ;;  %p216_p11 = scmp.lt.s32.totalorder %s732_s20, 3 }
  0x11   : > { %s185_s11 = scalar_lea.sflag [#allocation3], %s184_s28 }
  0x12   : > { %594 = dma.hbm_to_vmem [thread:$0]  (!%p592_p9), %s198_s8, 128, %s200_s10, %s185_s11  }
  0x13   : > { %p217_p12 = pnand %p579_p10, %p216_p11 }
  0x14   : > { %s222_s12 = sand.u32 (!%p217_p12), 1, %s716_s16  }
  0x15   : > { %220 = sbr.rel (%p217_p12) target bundleno = 344 (0x158), region = 32  ;;  %s580_s13 = sshll.u32 (!%p217_p12), %s222_s12, 3 }
  0x16   : > { %s223_s14 = scalar_lea.sflag (!%p217_p12), [#allocation3], %s222_s12  ;;  %s226_s15 = scalar_lea.vmem (!%p217_p12), [#allocation2], %s580_s13 }
  0x1a   : > { %707 = dma.done.wait (%p803_p7), %s223_s14, 128  }
  0x1b   : > { %709 = vsyncadd (%p803_p7), %s223_s14, 4294967168  ;;  %v734_v0 = vmov 0   ;;  %v289_v1 = vld [vmem:[%s226_s15] sm:$0xff]  ;;  %v291_v2 = vld [vmem:[%s897_s2] sm:$0xf]  ;;  %vm298_vm0 = vcmask 1043456   ;;  %v347_v29 = vlaneseq }
  0x1c   : > { %645 = vset.pattern.permute.xlu0 %v734_v0  ;;  %293 = vst [vmem:[#allocation1] ss:$2 sm:$0xff] %v289_v1  ;;  %p269_p13 = scmp.lt.s32.totalorder %s724_s18, 1  ;;  %vm410_vm3 = vcmask 1040384   ;;  %vm424_vm4 = vcmask 0  }
  0x1d   : > { %376 = vperm.xlu0 %645, %v291_v2   ;;  %v348_v33 = vshrl.u32 %v347_v29, 7 }
  0x1e   : > { %s914_s18 = smov (!%p269_p13, %s724_s18), 1 }
  0x1f   : > { %s581_s24 = sshll.u32 %s914_s18, 1  ;;  %s282_s5 = scalar_lea.vmem %s898_s3, %s914_s18 }
  0x20   : > { %s275_s28 = scalar_lea.vmem %s896_s1, %s581_s24  ;;  %s288_s9 = scalar_lea.vmem %s899_s4, %s914_s18 }
  0x21   : > { %v290_v30 = vld [vmem:[%s275_s28] sm:$0x3] }
  0x22   : > { %v349_v34 = vperm.slane %v290_v30, 0  ;;  %v350_v35 = vperm.slane %v290_v30, 1 }
  0x23   : > { %v294_v3 = vld.sshfl [vmem:[#allocation1] sm:$0xff pattern:$0x75316420]  ;;  %v295_v4 = vld.sshfl [vmem:[#allocation1 + $0x8] sm:$0xff pattern:$0x75316420] }
  0x24   : > { %v299_v5 = vsel %vm298_vm0, %v294_v3, -inf  ;;  %v306_v6 = vsel %vm298_vm0, %v295_v4, -inf  ;;  %vm847_vm1 = vcmp.eq.s32.totalorder %v348_v33, %v349_v34  ;;  %vm851_vm2 = vcmp.eq.s32.totalorder %v348_v33, %v350_v35 }
  0x25   : > { %v300_v7 = vrot.slane %v299_v5, 4  ;;  %v307_v8 = vrot.slane %v306_v6, 4 }
  0x27   : > { %v301_v9 = vmax.f32 %v299_v5, %v300_v7  ;;  %v308_v10 = vmax.f32 %v306_v6, %v307_v8 }
  0x29   : > { %v302_v11 = vrot.slane %v301_v9, 2  ;;  %v309_v12 = vrot.slane %v308_v10, 2 }
  0x2b   : > { %v303_v13 = vmax.f32 %v301_v9, %v302_v11  ;;  %v310_v14 = vmax.f32 %v308_v10, %v309_v12 }
  0x2d   : > { %v304_v15 = vrot.slane %v303_v13, 1  ;;  %v311_v16 = vrot.slane %v310_v14, 1 }
  0x2f   : > { %v830_v17 = vmax.f32 %v303_v13, %v304_v15  ;;  %v832_v18 = vmax.f32 %v310_v14, %v311_v16 }
  0x31   : > { %v315_v19 = vrot.slane %v832_v18, 4 }
  0x33   : > { %v316_v20 = vsel %vm298_vm0, %v830_v17, %v315_v19 }
  0x34   : > { %v318_v21 = vsub.f32 %v289_v1, %v316_v20 }
  0x36   : > { %v319_v22 = vmul.f32 1.442695, %v318_v21 }
  0x38   : > { %646 = vpow2.f32 %v319_v22 }
  0x3e   : > { %v647_v23 = vpop.eup %646 }
  0x3f   : > { %322 = vst [vmem:[#allocation1] ss:$2 sm:$0xff] %v647_v23 }
  0x46   : > { %v323_v24 = vld.sshfl [vmem:[#allocation1] sm:$0xff pattern:$0x75316420]  ;;  %v324_v25 = vld.sshfl [vmem:[#allocation1 + $0x8] sm:$0xff pattern:$0x75316420] }
  0x47   : > { %353 = vst [vmem:[#allocation1] ss:$2 sm:$0xff] %v289_v1  ;;  %v327_v26 = vsel %vm298_vm0, %v323_v24, 0.0  ;;  %v334_v27 = vsel %vm298_vm0, %v324_v25, 0.0 }
  0x48   : > { %v328_v28 = vrot.slane %v327_v26, 4  ;;  %v335_v31 = vrot.slane %v334_v27, 4 }
  0x4a   : > { %v329_v32 = vadd.f32 %v328_v28, %v327_v26  ;;  %v336_v36 = vadd.f32 %v335_v31, %v334_v27 }
  0x4c   : > { %v330_v37 = vrot.slane %v329_v32, 2  ;;  %v337_v42 = vrot.slane %v336_v36, 2 }
  0x4e   : > { %v354_v40 = vld.sshfl [vmem:[#allocation1] sm:$0xff pattern:$0x75316420]  ;;  %v355_v41 = vld.sshfl [vmem:[#allocation1 + $0x8] sm:$0xff pattern:$0x75316420]  ;;  %v331_v45 = vadd.f32 %v330_v37, %v329_v32  ;;  %v338_v46 = vadd.f32 %v337_v42, %v336_v36 }
  0x4f   : > { %v358_v43 = vsel %vm847_vm1, %v354_v40, 0.0  ;;  %v359_v44 = vsel %vm851_vm2, %v355_v41, 0.0 }
  0x50   : > { %v360_v47 = vsel %vm298_vm0, %v358_v43, 0.0  ;;  %v367_v48 = vsel %vm298_vm0, %v359_v44, 0.0  ;;  %v332_v49 = vrot.slane %v331_v45, 1  ;;  %v339_v52 = vrot.slane %v338_v46, 1 }
  0x51   : > { %v361_v50 = vrot.slane %v360_v47, 4  ;;  %v368_v51 = vrot.slane %v367_v48, 4 }
  0x52   : > { %v333_v53 = vadd.f32 %v332_v49, %v331_v45  ;;  %v340_v56 = vadd.f32 %v339_v52, %v338_v46 }
  0x53   : > { %v362_v54 = vadd.f32 %v361_v50, %v360_v47  ;;  %v369_v55 = vadd.f32 %v368_v51, %v367_v48 }
  0x54   : > { %648 = vlog2.f32 %v333_v53 }
  0x55   : > { %v363_v57 = vrot.slane %v362_v54, 2  ;;  %v370_v58 = vrot.slane %v369_v55, 2  ;;  %650 = vlog2.f32 %v340_v56 }
  0x57   : > { %v364_v59 = vadd.f32 %v363_v57, %v362_v54  ;;  %v371_v60 = vadd.f32 %v370_v58, %v369_v55 }
  0x59   : > { %v365_v2 = vrot.slane %v364_v59, 1  ;;  %v372_v3 = vrot.slane %v371_v60, 1 }
  0x5a   : > { %v649_v61 = vpop.eup %648 }
  0x5b   : > { %v651_v62 = vpop.eup %650  ;;  %v342_v8 = vmul.f32 0.6931472, %v649_v61  ;;  %v366_v12 = vadd.f32 %v365_v2, %v364_v59  ;;  %v373_v13 = vadd.f32 %v372_v3, %v371_v60 }
  0x5c   : > { %v344_v9 = vmul.f32 0.6931472, %v651_v62 }
  0x5d   : > { %v345_v16 = vadd.f32 %v342_v8, %v830_v17 }
  0x5e   : > { %v346_v19 = vadd.f32 %v344_v9, %v832_v18 }
  0x5f   : > { %v404_v24 = vsub.f32 %v345_v16, %v366_v12 }
  0x60   : > { %v405_v25 = vsub.f32 %v346_v19, %v373_v13 }
  0x8f   : > { %v377_v63 = vpop.permute.xlu0 %376 }
  0x90   : > { %v379_v0 = vsel %vm847_vm1, %v377_v63, 0.0  ;;  %v380_v1 = vsel %vm851_vm2, %v377_v63, 0.0 }
  0x91   : > { %v381_v4 = vsel %vm298_vm0, %v379_v0, 0.0  ;;  %v388_v5 = vsel %vm298_vm0, %v380_v1, 0.0 }
  0x92   : > { %v382_v6 = vrot.slane %v381_v4, 4  ;;  %v389_v7 = vrot.slane %v388_v5, 4 }
  0x94   : > { %v383_v10 = vadd.f32 %v382_v6, %v381_v4  ;;  %v390_v11 = vadd.f32 %v389_v7, %v388_v5 }
  0x96   : > { %v384_v14 = vrot.slane %v383_v10, 2  ;;  %v391_v15 = vrot.slane %v390_v11, 2 }
  0x98   : > { %v385_v20 = vadd.f32 %v384_v14, %v383_v10  ;;  %v392_v21 = vadd.f32 %v391_v15, %v390_v11 }
  0x9a   : > { %v386_v22 = vrot.slane %v385_v20, 1  ;;  %v393_v23 = vrot.slane %v392_v21, 1 }
  0x9c   : > { %v387_v26 = vadd.f32 %v386_v22, %v385_v20  ;;  %v394_v27 = vadd.f32 %v393_v23, %v392_v21 }
  0x9e   : > { %v428_v28 = vsel %vm410_vm3, %v387_v26, 0.0  ;;  %v429_v29 = vsel %vm410_vm3, %v394_v27, 0.0  ;;  %v406_v30 = vmul.f32 %v404_v24, %v387_v26  ;;  %v407_v31 = vmul.f32 %v405_v25, %v394_v27 }
  0x9f   : > { %v430_v32 = vadd.f32 %v429_v29, %v428_v28 }
  0xa0   : > { %v411_v33 = vsel %vm410_vm3, %v406_v30, 0.0  ;;  %v412_v34 = vsel %vm410_vm3, %v407_v31, 0.0 }
  0xa1   : > { %431 = vadd.xlane.f32.xlu1 %v430_v32  ;;  %v413_v17 = vadd.f32 %v412_v34, %v411_v33 }
  0xa3   : > { %414 = vadd.xlane.f32.xlu0 %v413_v17 }
 0x114   : > { %v432_v18 = vpop.xlane.xlu1 %431 }
 0x115   : > { %v433_v35 = vrot.slane %v432_v18, 4 }
 0x116   : > { %v415_v36 = vpop.xlane.xlu0 %414 }
 0x117   : > { %v434_v37 = vadd.f32 %v433_v35, %v432_v18  ;;  %v416_v38 = vrot.slane %v415_v36, 4 }
 0x119   : > { %v435_v39 = vrot.slane %v434_v37, 2  ;;  %v417_v40 = vadd.f32 %v416_v38, %v415_v36 }
 0x11b   : > { %v436_v41 = vadd.f32 %v435_v39, %v434_v37  ;;  %v418_v42 = vrot.slane %v417_v40, 2 }
 0x11d   : > { %v419_v43 = vadd.f32 %v418_v42, %v417_v40  ;;  %v437_v44 = vrot.slane %v436_v41, 1 }
 0x11f   : > { %v420_v45 = vrot.slane %v419_v43, 1  ;;  %v438_v47 = vadd.f32 %v437_v44, %v436_v41 }
 0x121   : > { %v421_v46 = vadd.f32 %v420_v45, %v419_v43 }
 0x123   : > { %585 = vpush %v421_v46 }
 0x124   : > { %587 = vpush %v438_v47 }
 0x154   : > { %s586_s6 = spop %585 }
 0x155   : > { %v423_v48 = vstv %s586_s6  ;;  %s588_s10 = spop %587 }
 0x156   : > { %425 = vst.msk [vmem:[%s282_s5] sm:$0x1] %vm424_vm4, %v423_v48  ;;  %v440_v49 = vstv %s588_s10 }
 0x157   : > { %441 = vst.msk [vmem:[%s288_s9] sm:$0x1] %vm424_vm4, %v440_v49 }
 0x158 PF: > { %s18_s20 = sadd.s32 1, %s732_s20   ;;  %s906_s15 = smov %s716_s16 }
 0x159   : > { %p15_p0 = scmp.ge.s32.totalorder %s18_s20, 4   ;;  %s907_s16 = smov %s720_s17 }
 0x15a   : > { %s908_s17 = smov %s809_s27  ;;  %s909_s18 = smov %s728_s19 }
 0x15b   : > { %s910_s19 = smov %s912_s22  ;;  %17 = sbr.rel (!%p15_p0) target bundleno = 4 (0x4), region = 87 }
 0x160   :  { %483 = vsyncpa [#allocation3], 1 }
 0x161   :  { %485 = vsyncpa [#allocation3 + $0x1], 1 }

</bundles_post_ra>
